<compile_context>
chip_gen: v7x
topology: tpu7x:2x2x1
jax: 0.10.0
libtpu: 0.0.40
codegen_flags: <defaults>
</compile_context>

<pallas_src>
import functools
from typing import NamedTuple

import jax
import jax.numpy as jnp
from jax.experimental import pallas as pl
from jax.experimental.pallas import tpu as pltpu


# ----------------------------------------------------------------------------
# Small host-side helpers (generation-aware defaults).
# ----------------------------------------------------------------------------
def _round_up(v, m):
    return ((v + m - 1) // m) * m


def _device_kind():
    try:
        return jax.devices()[0].device_kind.lower()
    except Exception:  # pragma: no cover - defensive, e.g. no TPU visible
        return ""


def _num_tensorcores():
    dk = _device_kind()
    # v7x (and v4 megacore) expose two TensorCores behind one Pallas device.
    return 2 if ("v7" in dk or "v4" in dk) else 1


def _vmem_budget_bytes():
    dk = _device_kind()
    if "v7" in dk:
        return 48 << 20       # 64 MiB physical per TC on v7x -> leave headroom
    return 100 << 20          # 128 MiB physical on v5e / v6e (and v4/v5p)


def _vmem_estimate_bytes(batch_block, seq_len, hidden, outp, mm_bytes):
    """Approximate per-invocation VMEM residency (double-buffered operands)."""
    h4 = 4 * hidden
    preact = 2 * seq_len * batch_block * h4 * 4      # f32 pre-activations
    whh = 2 * hidden * h4 * mm_bytes                 # recurrent weights
    wlin = 2 * seq_len * hidden * outp * mm_bytes    # final Linear weights
    blin = 2 * outp * 4
    out = 2 * batch_block * outp * 4
    acc = batch_block * outp * 4                     # live accumulator
    return preact + whh + wlin + blin + out + acc + (2 << 20)  # +2 MiB headroom


# ----------------------------------------------------------------------------
# Kernel: serial recurrence + incrementally accumulated Linear, one batch block
# fully resident in VMEM.
# ----------------------------------------------------------------------------
def mv_lstm_kernel(preact_ref, whh_ref, wlin_ref, blin_ref, out_ref, *,
                   hidden, seq_len, block_b, unroll_limit, gate_dtype):
    """
    preact_ref: (S, block_b, 4H) f32   precomputed x @ W_ih^T + (b_ih + b_hh)
    whh_ref   : (H, 4H)                recurrent weights (f32 or bf16)
    wlin_ref  : (S, H, OUTP)           final Linear weights, lane-padded
    blin_ref  : (1, OUTP)   f32        final Linear bias, lane-padded
    out_ref   : (block_b, OUTP) f32
    """
    H = hidden
    OUTP = out_ref.shape[-1]
    whh = whh_ref[...]                    # resident recurrent weights
    wl_dtype = wlin_ref.dtype

    def cell(h, c, acc, gates, wlin_t):
        # Gate nonlinearities; optionally evaluated in bf16 (EUP lever on
        # v6e/v7x).  Cell-state math stays f32.
        g_ = gates.astype(gate_dtype)
        i = jax.nn.sigmoid(g_[:, 0 * H:1 * H]).astype(jnp.float32)
        f = jax.nn.sigmoid(g_[:, 1 * H:2 * H]).astype(jnp.float32)
        g = jnp.tanh(g_[:, 2 * H:3 * H]).astype(jnp.float32)
        o = jax.nn.sigmoid(g_[:, 3 * H:4 * H]).astype(jnp.float32)
        c = f * c + i * g
        h = o * jnp.tanh(c)
        # Incremental Linear accumulation: off the h->h dependence chain, so it
        # overlaps with the next step's recurrent matmul instead of running as
        # a serial epilogue; also avoids a (B, S*H) staging scratch.
        acc = acc + jnp.dot(h.astype(wl_dtype), wlin_t,
                            preferred_element_type=jnp.float32)
        return h, c, acc

    h0 = jnp.zeros((block_b, H), jnp.float32)
    c0 = jnp.zeros((block_b, H), jnp.float32)
    acc0 = jnp.zeros((block_b, OUTP), jnp.float32)   # fresh per invocation

    def step(t, carry):
        h, c, acc = carry
        gates = preact_ref[t] + jnp.dot(h.astype(whh.dtype), whh,
                                        preferred_element_type=jnp.float32)
        return cell(h, c, acc, gates, wlin_ref[t])

    if seq_len <= unroll_limit:
        # Statically unrolled time loop (short sequences): no loop overhead,
        # full scheduler visibility.
        # TODO(synk): for small H the recurrent matmul and the per-step Linear
        # slice could be fused into one (H, 4H+OUTP) matmul per step.
        carry = (h0, c0, acc0)
        for t in range(seq_len):
            carry = step(t, carry)
        h, c, acc = carry
    else:
        # Long sequences: bounded live ranges / program size via fori_loop with
        # modest unrolling.
        h, c, acc = jax.lax.fori_loop(0, seq_len, step, (h0, c0, acc0),
                                      unroll=min(8, seq_len))

    out_ref[...] = acc + blin_ref[...]


# ----------------------------------------------------------------------------
# One-time weight preparation (hoisted out of the per-call path).
# ----------------------------------------------------------------------------
class MVLSTMParams(NamedTuple):
    wih_t: jax.Array      # (F, 4H)       mm_dtype
    gate_bias: jax.Array  # (4H,)         f32
    whh_t: jax.Array      # (H, 4H)       mm_dtype
    wlin_p: jax.Array     # (S, H, OUTP)  mm_dtype, lane-padded
    blin_p: jax.Array     # (1, OUTP)     f32, lane-padded
    hidden: int
    seq_len: int
    out_dim: int


def prepare_mv_lstm_params(w_ih, w_hh, b_ih, b_hh, w_lin, b_lin, *,
                           use_bf16_matmul=False):
    """Precompute transposed / cast / lane-padded weights once at model init."""
    H4, _ = w_ih.shape
    H = H4 // 4
    out_dim, SH = w_lin.shape
    S = SH // H
    OUTP = _round_up(out_dim, 128)
    mm_dtype = jnp.bfloat16 if use_bf16_matmul else jnp.float32

    wih_t = jnp.transpose(w_ih).astype(mm_dtype)                       # (F, 4H)
    gate_bias = (b_ih + b_hh).astype(jnp.float32)                      # (4H,)
    # TODO(synk): for very long sequences consider keeping W_hh in f32 — in
    # bf16 mode h is re-quantized every step and rounding compounds through
    # the recurrence.
    whh_t = jnp.transpose(w_hh).astype(mm_dtype)                       # (H, 4H)
    # torch flattens lstm_out (B,S,H)->(B,S*H); Linear weight is (out, S*H).
    # Reshape W_lin^T to (S, H, out) so step t uses wlin_p[t]; lane-pad out.
    wlin_t = jnp.transpose(w_lin).reshape(S, H, out_dim).astype(mm_dtype)
    wlin_p = jnp.zeros((S, H, OUTP), mm_dtype).at[:, :, :out_dim].set(wlin_t)
    blin_p = jnp.zeros((1, OUTP), jnp.float32).at[0, :out_dim].set(
        b_lin.astype(jnp.float32))
    return MVLSTMParams(wih_t, gate_bias, whh_t, wlin_p, blin_p, H, S, out_dim)


# ----------------------------------------------------------------------------
# Forward wrapper.
# ----------------------------------------------------------------------------
def mv_lstm_forward(x, params: MVLSTMParams, *, batch_block=None,
                    use_bf16_gates=False, unroll_limit=32):
    """x: (B, S, F) float32. Returns (B, output_size) float32."""
    B, S, F = x.shape
    assert S == params.seq_len, (S, params.seq_len)
    H = params.hidden
    H4 = 4 * H
    _, _, OUTP = params.wlin_p.shape
    mm_dtype = params.wih_t.dtype
    mm_bytes = jnp.dtype(mm_dtype).itemsize

    # ---- batch-block selection + generation-specific VMEM budgeting --------
    budget = _vmem_budget_bytes()
    if batch_block is None:
        ncores = _num_tensorcores()
        n_blocks = ncores if (ncores > 1 and _round_up(B, 8) >= 16) else 1
        batch_block = _round_up(pl.cdiv(_round_up(B, 8), n_blocks), 8)
    else:
        batch_block = _round_up(batch_block, 8)
    while (batch_block > 8 and
           _vmem_estimate_bytes(batch_block, S, H, OUTP, mm_bytes) > budget):
        batch_block = _round_up(pl.cdiv(batch_block, 2), 8)
    # TODO(synk): if even batch_block=8 overflows the budget (very large S*H),
    # stream preact / W_lin over time with pltpu.emit_pipeline instead of
    # keeping them fully resident.
    Bp = _round_up(B, batch_block)
    num_b_blocks = Bp // batch_block

    # ---- hoisted, time-parallel input projection (one plain XLA matmul) ----
    # Pad + transpose x (the smallest operand), NOT the (S,B,4H) preactivations.
    x_p = jnp.pad(x, ((0, Bp - B), (0, 0), (0, 0)))
    x_tm = jnp.transpose(x_p, (1, 0, 2)).astype(mm_dtype)              # (S, Bp, F)
    preact = jnp.dot(x_tm.reshape(S * Bp, F), params.wih_t,
                     preferred_element_type=jnp.float32)
    preact = preact.reshape(S, Bp, H4) + params.gate_bias              # f32

    kernel = functools.partial(
        mv_lstm_kernel, hidden=H, seq_len=S, block_b=batch_block,
        unroll_limit=unroll_limit,
        gate_dtype=jnp.bfloat16 if use_bf16_gates else jnp.float32)

    # TODO(synk): the W_hh / W_lin / b_lin specs are grid-invariant; single-
    # buffering them (pipeline_mode=pl.Buffered(1)) would halve their VMEM
    # footprint when num_b_blocks > 1 — left out pending a support sweep.
    out_p = pl.pallas_call(
        kernel,
        out_shape=jax.ShapeDtypeStruct((Bp, OUTP), jnp.float32),
        grid_spec=pltpu.PrefetchScalarGridSpec(
            num_scalar_prefetch=0,
            grid=(num_b_blocks,),
            in_specs=[
                pl.BlockSpec((S, batch_block, H4), lambda b: (0, b, 0)),  # preact
                pl.BlockSpec((H, H4), lambda b: (0, 0)),                  # W_hh^T
                pl.BlockSpec((S, H, OUTP), lambda b: (0, 0, 0)),          # W_lin
                pl.BlockSpec((1, OUTP), lambda b: (0, 0)),                # b_lin
            ],
            out_specs=pl.BlockSpec((batch_block, OUTP), lambda b: (b, 0)),
        ),
        compiler_params=pltpu.CompilerParams(
            dimension_semantics=("parallel",),       # batch blocks independent
            vmem_limit_bytes=int(budget)),
    )(preact, params.whh_t, params.wlin_p, params.blin_p)

    return out_p[:B, :params.out_dim]


# ----------------------------------------------------------------------------
# Pure-JAX reference (torch.nn.LSTM + Linear semantics) and self-test.
# ----------------------------------------------------------------------------
def mv_lstm_reference(x, w_ih, w_hh, b_ih, b_hh, w_lin, b_lin):
    B, S, F = x.shape
    H = w_hh.shape[1]

    def step(carry, x_t):
        h, c = carry
        gates = x_t @ w_ih.T + b_ih + h @ w_hh.T + b_hh
        i, f, g, o = jnp.split(gates, 4, axis=-1)
        i = jax.nn.sigmoid(i)
        f = jax.nn.sigmoid(f)
        g = jnp.tanh(g)
        o = jax.nn.sigmoid(o)
        c = f * c + i * g
        h = o * jnp.tanh(c)
        return (h, c), h

    h0 = jnp.zeros((B, H), jnp.float32)
    c0 = jnp.zeros((B, H), jnp.float32)
    (_, _), hs = jax.lax.scan(step, (h0, c0), jnp.transpose(x, (1, 0, 2)))
    lstm_out = jnp.transpose(hs, (1, 0, 2)).reshape(B, -1)   # (B, S*H)
    return lstm_out @ w_lin.T + b_lin


def _make_case(key, B, S, F, H, OUT):
    keys = jax.random.split(key, 7)
    k = 1.0 / jnp.sqrt(H)
    x = jax.random.normal(keys[0], (B, S, F), dtype=jnp.float32)
    w_ih = jax.random.uniform(keys[1], (4 * H, F), jnp.float32, -k, k)
    w_hh = jax.random.uniform(keys[2], (4 * H, H), jnp.float32, -k, k)
    b_ih = jax.random.uniform(keys[3], (4 * H,), jnp.float32, -k, k)
    b_hh = jax.random.uniform(keys[4], (4 * H,), jnp.float32, -k, k)
    k_lin = 1.0 / jnp.sqrt(S * H)
    w_lin = jax.random.uniform(keys[5], (OUT, S * H), jnp.float32, -k_lin, k_lin)
    b_lin = jax.random.uniform(keys[6], (OUT,), jnp.float32, -k_lin, k_lin)
    return x, (w_ih, w_hh, b_ih, b_hh, w_lin, b_lin)


if __name__ == "__main__":
    # Case 1: module-consistent shapes (batch=2, seq=8, features=4, hidden=32,
    # output_size=1), f32 path — exact.
    B, S, F, H, OUT = 2, 8, 4, 32, 1
    x, w = _make_case(jax.random.PRNGKey(0), B, S, F, H, OUT)
    ref = mv_lstm_reference(x, *w)
    params = prepare_mv_lstm_params(*w)                 # prepared ONCE, reused
    out = jax.block_until_ready(mv_lstm_forward(x, params))
    assert out.shape == (B, OUT), out.shape
    assert jnp.allclose(out, ref, atol=1e-4, rtol=1e-4), (out, ref)

    # Case 2: bf16 MXU operands (recommended on all generations); accumulation
    # and all elementwise math remain f32, so only operand rounding differs.
    params_bf16 = prepare_mv_lstm_params(*w, use_bf16_matmul=True)
    out_bf16 = jax.block_until_ready(mv_lstm_forward(x, params_bf16))
    assert out_bf16.shape == (B, OUT), out_bf16.shape
    assert jnp.allclose(out_bf16, ref, atol=2e-2, rtol=2e-2), (out_bf16, ref)

    # Case 3: batch split over multiple grid blocks (with batch padding).
    B3 = 20
    x3, w3 = _make_case(jax.random.PRNGKey(1), B3, S, F, H, OUT)
    ref3 = mv_lstm_reference(x3, *w3)
    params3 = prepare_mv_lstm_params(*w3)
    out3 = jax.block_until_ready(mv_lstm_forward(x3, params3, batch_block=8))
    assert out3.shape == (B3, OUT), out3.shape
    assert jnp.allclose(out3, ref3, atol=1e-4, rtol=1e-4), (out3, ref3)

    # Case 4: long sequence -> in-kernel lax.fori_loop(unroll=8) path.
    S4 = 48
    x4, w4 = _make_case(jax.random.PRNGKey(2), 2, S4, F, H, OUT)
    ref4 = mv_lstm_reference(x4, *w4)
    params4 = prepare_mv_lstm_params(*w4)
    out4 = jax.block_until_ready(mv_lstm_forward(x4, params4))
    assert out4.shape == (2, OUT), out4.shape
    assert jnp.allclose(out4, ref4, atol=1e-3, rtol=1e-3), (out4, ref4)

    print("KERNEL_OK")
</pallas_src>

<mosaic_0001>
module attributes {stable_mosaic.version = 11 : i64} {
  func.func @mv_lstm_kernel(%arg0: i32, %arg1: memref<8x8x128xf32, #tpu.memory_space<vmem>>, %arg2: memref<32x128xf32, #tpu.memory_space<vmem>>, %arg3: memref<8x32x128xf32, #tpu.memory_space<vmem>>, %arg4: memref<1x128xf32, #tpu.memory_space<vmem>>, %arg5: memref<8x128xf32, #tpu.memory_space<vmem>>) attributes {dimension_semantics = [#tpu.dimension_semantics<parallel>], iteration_bounds = array<i64: 1>, scalar_prefetch = 0 : i64, scratch_operands = 0 : i64, tpu.core_type = #tpu.core_type<tc>, window_params = [{transform_indices = @transform_0, window_bounds = array<i64: 8, 8, 128>}, {pipeline_mode = #tpu.pipeline_mode<synchronous>, transform_indices = @transform_1, window_bounds = array<i64: 32, 128>}, {pipeline_mode = #tpu.pipeline_mode<synchronous>, transform_indices = @transform_2, window_bounds = array<i64: 8, 32, 128>}, {pipeline_mode = #tpu.pipeline_mode<synchronous>, transform_indices = @transform_3, window_bounds = array<i64: 1, 128>}, {transform_indices = @transform_4, window_bounds = array<i64: 8, 128>}]} {
    %c0 = arith.constant 0 : index
    %c0_0 = arith.constant 0 : index
    %0 = vector.load %arg2[%c0, %c0_0] : memref<32x128xf32, #tpu.memory_space<vmem>>, vector<32x128xf32>
    %cst = arith.constant 0.000000e+00 : f32
    %1 = vector.broadcast %cst : f32 to vector<8x32xf32>
    %cst_1 = arith.constant 0.000000e+00 : f32
    %2 = vector.broadcast %cst_1 : f32 to vector<8x32xf32>
    %cst_2 = arith.constant 0.000000e+00 : f32
    %3 = vector.broadcast %cst_2 : f32 to vector<8x128xf32>
    %c0_3 = arith.constant 0 : index
    %c0_4 = arith.constant 0 : index
    %c0_5 = arith.constant 0 : index
    %4 = vector.load %arg1[%c0_3, %c0_4, %c0_5] : memref<8x8x128xf32, #tpu.memory_space<vmem>>, vector<1x8x128xf32>
    %5 = vector.shape_cast %4 : vector<1x8x128xf32> to vector<8x128xf32>
    %cst_6 = arith.constant dense<0.000000e+00> : vector<8x128xf32>
    %6 = tpu.matmul %1, %0, %cst_6 {dimension_numbers = #tpu.dot_dimension_numbers<[1], [0], [0], [1], [0, 0, 1, 1], [], []>} : vector<8x32xf32>, vector<32x128xf32>, vector<8x128xf32> -> vector<8x128xf32>
    %7 = arith.addf %5, %6 : vector<8x128xf32>
    %c0_7 = arith.constant 0 : index
    %c0_8 = arith.constant 0 : index
    %c0_9 = arith.constant 0 : index
    %8 = vector.load %arg3[%c0_7, %c0_8, %c0_9] : memref<8x32x128xf32, #tpu.memory_space<vmem>>, vector<1x32x128xf32>
    %9 = vector.shape_cast %8 : vector<1x32x128xf32> to vector<32x128xf32>
    %10 = vector.extract_strided_slice %7 {offsets = [0, 0], sizes = [8, 32], strides = [1, 1]} : vector<8x128xf32> to vector<8x32xf32>
    %11 = arith.negf %10 : vector<8x32xf32>
    %12 = math.exp %11 : vector<8x32xf32>
    %cst_10 = arith.constant 1.000000e+00 : f32
    %13 = vector.broadcast %cst_10 : f32 to vector<8x32xf32>
    %14 = arith.addf %13, %12 : vector<8x32xf32>
    %15 = arith.divf %13, %14 : vector<8x32xf32>
    %16 = vector.extract_strided_slice %7 {offsets = [0, 32], sizes = [8, 32], strides = [1, 1]} : vector<8x128xf32> to vector<8x32xf32>
    %17 = arith.negf %16 : vector<8x32xf32>
    %18 = math.exp %17 : vector<8x32xf32>
    %cst_11 = arith.constant 1.000000e+00 : f32
    %19 = vector.broadcast %cst_11 : f32 to vector<8x32xf32>
    %20 = arith.addf %19, %18 : vector<8x32xf32>
    %21 = arith.divf %19, %20 : vector<8x32xf32>
    %22 = vector.extract_strided_slice %7 {offsets = [0, 64], sizes = [8, 32], strides = [1, 1]} : vector<8x128xf32> to vector<8x32xf32>
    %23 = math.tanh %22 : vector<8x32xf32>
    %24 = vector.extract_strided_slice %7 {offsets = [0, 96], sizes = [8, 32], strides = [1, 1]} : vector<8x128xf32> to vector<8x32xf32>
    %25 = arith.negf %24 : vector<8x32xf32>
    %26 = math.exp %25 : vector<8x32xf32>
    %cst_12 = arith.constant 1.000000e+00 : f32
    %27 = vector.broadcast %cst_12 : f32 to vector<8x32xf32>
    %28 = arith.addf %27, %26 : vector<8x32xf32>
    %29 = arith.divf %27, %28 : vector<8x32xf32>
    %30 = arith.mulf %21, %2 : vector<8x32xf32>
    %31 = arith.mulf %15, %23 : vector<8x32xf32>
    %32 = arith.addf %30, %31 : vector<8x32xf32>
    %33 = math.tanh %32 : vector<8x32xf32>
    %34 = arith.mulf %29, %33 : vector<8x32xf32>
    %cst_13 = arith.constant dense<0.000000e+00> : vector<8x128xf32>
    %35 = tpu.matmul %34, %9, %cst_13 {dimension_numbers = #tpu.dot_dimension_numbers<[1], [0], [0], [1], [0, 0, 1, 1], [], []>} : vector<8x32xf32>, vector<32x128xf32>, vector<8x128xf32> -> vector<8x128xf32>
    %36 = arith.addf %3, %35 : vector<8x128xf32>
    %c1 = arith.constant 1 : index
    %c0_14 = arith.constant 0 : index
    %c0_15 = arith.constant 0 : index
    %37 = vector.load %arg1[%c1, %c0_14, %c0_15] : memref<8x8x128xf32, #tpu.memory_space<vmem>>, vector<1x8x128xf32>
    %38 = vector.shape_cast %37 : vector<1x8x128xf32> to vector<8x128xf32>
    %cst_16 = arith.constant dense<0.000000e+00> : vector<8x128xf32>
    %39 = tpu.matmul %34, %0, %cst_16 {dimension_numbers = #tpu.dot_dimension_numbers<[1], [0], [0], [1], [0, 0, 1, 1], [], []>} : vector<8x32xf32>, vector<32x128xf32>, vector<8x128xf32> -> vector<8x128xf32>
    %40 = arith.addf %38, %39 : vector<8x128xf32>
    %c1_17 = arith.constant 1 : index
    %c0_18 = arith.constant 0 : index
    %c0_19 = arith.constant 0 : index
    %41 = vector.load %arg3[%c1_17, %c0_18, %c0_19] : memref<8x32x128xf32, #tpu.memory_space<vmem>>, vector<1x32x128xf32>
    %42 = vector.shape_cast %41 : vector<1x32x128xf32> to vector<32x128xf32>
    %43 = vector.extract_strided_slice %40 {offsets = [0, 0], sizes = [8, 32], strides = [1, 1]} : vector<8x128xf32> to vector<8x32xf32>
    %44 = arith.negf %43 : vector<8x32xf32>
    %45 = math.exp %44 : vector<8x32xf32>
    %cst_20 = arith.constant 1.000000e+00 : f32
    %46 = vector.broadcast %cst_20 : f32 to vector<8x32xf32>
    %47 = arith.addf %46, %45 : vector<8x32xf32>
    %48 = arith.divf %46, %47 : vector<8x32xf32>
    %49 = vector.extract_strided_slice %40 {offsets = [0, 32], sizes = [8, 32], strides = [1, 1]} : vector<8x128xf32> to vector<8x32xf32>
    %50 = arith.negf %49 : vector<8x32xf32>
    %51 = math.exp %50 : vector<8x32xf32>
    %cst_21 = arith.constant 1.000000e+00 : f32
    %52 = vector.broadcast %cst_21 : f32 to vector<8x32xf32>
    %53 = arith.addf %52, %51 : vector<8x32xf32>
    %54 = arith.divf %52, %53 : vector<8x32xf32>
    %55 = vector.extract_strided_slice %40 {offsets = [0, 64], sizes = [8, 32], strides = [1, 1]} : vector<8x128xf32> to vector<8x32xf32>
    %56 = math.tanh %55 : vector<8x32xf32>
    %57 = vector.extract_strided_slice %40 {offsets = [0, 96], sizes = [8, 32], strides = [1, 1]} : vector<8x128xf32> to vector<8x32xf32>
    %58 = arith.negf %57 : vector<8x32xf32>
    %59 = math.exp %58 : vector<8x32xf32>
    %cst_22 = arith.constant 1.000000e+00 : f32
    %60 = vector.broadcast %cst_22 : f32 to vector<8x32xf32>
    %61 = arith.addf %60, %59 : vector<8x32xf32>
    %62 = arith.divf %60, %61 : vector<8x32xf32>
    %63 = arith.mulf %54, %32 : vector<8x32xf32>
    %64 = arith.mulf %48, %56 : vector<8x32xf32>
    %65 = arith.addf %63, %64 : vector<8x32xf32>
    %66 = math.tanh %65 : vector<8x32xf32>
    %67 = arith.mulf %62, %66 : vector<8x32xf32>
    %cst_23 = arith.constant dense<0.000000e+00> : vector<8x128xf32>
    %68 = tpu.matmul %67, %42, %cst_23 {dimension_numbers = #tpu.dot_dimension_numbers<[1], [0], [0], [1], [0, 0, 1, 1], [], []>} : vector<8x32xf32>, vector<32x128xf32>, vector<8x128xf32> -> vector<8x128xf32>
    %69 = arith.addf %36, %68 : vector<8x128xf32>
    %c2 = arith.constant 2 : index
    %c0_24 = arith.constant 0 : index
    %c0_25 = arith.constant 0 : index
    %70 = vector.load %arg1[%c2, %c0_24, %c0_25] : memref<8x8x128xf32, #tpu.memory_space<vmem>>, vector<1x8x128xf32>
    %71 = vector.shape_cast %70 : vector<1x8x128xf32> to vector<8x128xf32>
    %cst_26 = arith.constant dense<0.000000e+00> : vector<8x128xf32>
    %72 = tpu.matmul %67, %0, %cst_26 {dimension_numbers = #tpu.dot_dimension_numbers<[1], [0], [0], [1], [0, 0, 1, 1], [], []>} : vector<8x32xf32>, vector<32x128xf32>, vector<8x128xf32> -> vector<8x128xf32>
    %73 = arith.addf %71, %72 : vector<8x128xf32>
    %c2_27 = arith.constant 2 : index
    %c0_28 = arith.constant 0 : index
    %c0_29 = arith.constant 0 : index
    %74 = vector.load %arg3[%c2_27, %c0_28, %c0_29] : memref<8x32x128xf32, #tpu.memory_space<vmem>>, vector<1x32x128xf32>
    %75 = vector.shape_cast %74 : vector<1x32x128xf32> to vector<32x128xf32>
    %76 = vector.extract_strided_slice %73 {offsets = [0, 0], sizes = [8, 32], strides = [1, 1]} : vector<8x128xf32> to vector<8x32xf32>
    %77 = arith.negf %76 : vector<8x32xf32>
    %78 = math.exp %77 : vector<8x32xf32>
    %cst_30 = arith.constant 1.000000e+00 : f32
    %79 = vector.broadcast %cst_30 : f32 to vector<8x32xf32>
    %80 = arith.addf %79, %78 : vector<8x32xf32>
    %81 = arith.divf %79, %80 : vector<8x32xf32>
    %82 = vector.extract_strided_slice %73 {offsets = [0, 32], sizes = [8, 32], strides = [1, 1]} : vector<8x128xf32> to vector<8x32xf32>
    %83 = arith.negf %82 : vector<8x32xf32>
    %84 = math.exp %83 : vector<8x32xf32>
    %cst_31 = arith.constant 1.000000e+00 : f32
    %85 = vector.broadcast %cst_31 : f32 to vector<8x32xf32>
    %86 = arith.addf %85, %84 : vector<8x32xf32>
    %87 = arith.divf %85, %86 : vector<8x32xf32>
    %88 = vector.extract_strided_slice %73 {offsets = [0, 64], sizes = [8, 32], strides = [1, 1]} : vector<8x128xf32> to vector<8x32xf32>
    %89 = math.tanh %88 : vector<8x32xf32>
    %90 = vector.extract_strided_slice %73 {offsets = [0, 96], sizes = [8, 32], strides = [1, 1]} : vector<8x128xf32> to vector<8x32xf32>
    %91 = arith.negf %90 : vector<8x32xf32>
    %92 = math.exp %91 : vector<8x32xf32>
    %cst_32 = arith.constant 1.000000e+00 : f32
    %93 = vector.broadcast %cst_32 : f32 to vector<8x32xf32>
    %94 = arith.addf %93, %92 : vector<8x32xf32>
    %95 = arith.divf %93, %94 : vector<8x32xf32>
    %96 = arith.mulf %87, %65 : vector<8x32xf32>
    %97 = arith.mulf %81, %89 : vector<8x32xf32>
    %98 = arith.addf %96, %97 : vector<8x32xf32>
    %99 = math.tanh %98 : vector<8x32xf32>
    %100 = arith.mulf %95, %99 : vector<8x32xf32>
    %cst_33 = arith.constant dense<0.000000e+00> : vector<8x128xf32>
    %101 = tpu.matmul %100, %75, %cst_33 {dimension_numbers = #tpu.dot_dimension_numbers<[1], [0], [0], [1], [0, 0, 1, 1], [], []>} : vector<8x32xf32>, vector<32x128xf32>, vector<8x128xf32> -> vector<8x128xf32>
    %102 = arith.addf %69, %101 : vector<8x128xf32>
    %c3 = arith.constant 3 : index
    %c0_34 = arith.constant 0 : index
    %c0_35 = arith.constant 0 : index
    %103 = vector.load %arg1[%c3, %c0_34, %c0_35] : memref<8x8x128xf32, #tpu.memory_space<vmem>>, vector<1x8x128xf32>
    %104 = vector.shape_cast %103 : vector<1x8x128xf32> to vector<8x128xf32>
    %cst_36 = arith.constant dense<0.000000e+00> : vector<8x128xf32>
    %105 = tpu.matmul %100, %0, %cst_36 {dimension_numbers = #tpu.dot_dimension_numbers<[1], [0], [0], [1], [0, 0, 1, 1], [], []>} : vector<8x32xf32>, vector<32x128xf32>, vector<8x128xf32> -> vector<8x128xf32>
    %106 = arith.addf %104, %105 : vector<8x128xf32>
    %c3_37 = arith.constant 3 : index
    %c0_38 = arith.constant 0 : index
    %c0_39 = arith.constant 0 : index
    %107 = vector.load %arg3[%c3_37, %c0_38, %c0_39] : memref<8x32x128xf32, #tpu.memory_space<vmem>>, vector<1x32x128xf32>
    %108 = vector.shape_cast %107 : vector<1x32x128xf32> to vector<32x128xf32>
    %109 = vector.extract_strided_slice %106 {offsets = [0, 0], sizes = [8, 32], strides = [1, 1]} : vector<8x128xf32> to vector<8x32xf32>
    %110 = arith.negf %109 : vector<8x32xf32>
    %111 = math.exp %110 : vector<8x32xf32>
    %cst_40 = arith.constant 1.000000e+00 : f32
    %112 = vector.broadcast %cst_40 : f32 to vector<8x32xf32>
    %113 = arith.addf %112, %111 : vector<8x32xf32>
    %114 = arith.divf %112, %113 : vector<8x32xf32>
    %115 = vector.extract_strided_slice %106 {offsets = [0, 32], sizes = [8, 32], strides = [1, 1]} : vector<8x128xf32> to vector<8x32xf32>
    %116 = arith.negf %115 : vector<8x32xf32>
    %117 = math.exp %116 : vector<8x32xf32>
    %cst_41 = arith.constant 1.000000e+00 : f32
    %118 = vector.broadcast %cst_41 : f32 to vector<8x32xf32>
    %119 = arith.addf %118, %117 : vector<8x32xf32>
    %120 = arith.divf %118, %119 : vector<8x32xf32>
    %121 = vector.extract_strided_slice %106 {offsets = [0, 64], sizes = [8, 32], strides = [1, 1]} : vector<8x128xf32> to vector<8x32xf32>
    %122 = math.tanh %121 : vector<8x32xf32>
    %123 = vector.extract_strided_slice %106 {offsets = [0, 96], sizes = [8, 32], strides = [1, 1]} : vector<8x128xf32> to vector<8x32xf32>
    %124 = arith.negf %123 : vector<8x32xf32>
    %125 = math.exp %124 : vector<8x32xf32>
    %cst_42 = arith.constant 1.000000e+00 : f32
    %126 = vector.broadcast %cst_42 : f32 to vector<8x32xf32>
    %127 = arith.addf %126, %125 : vector<8x32xf32>
    %128 = arith.divf %126, %127 : vector<8x32xf32>
    %129 = arith.mulf %120, %98 : vector<8x32xf32>
    %130 = arith.mulf %114, %122 : vector<8x32xf32>
    %131 = arith.addf %129, %130 : vector<8x32xf32>
    %132 = math.tanh %131 : vector<8x32xf32>
    %133 = arith.mulf %128, %132 : vector<8x32xf32>
    %cst_43 = arith.constant dense<0.000000e+00> : vector<8x128xf32>
    %134 = tpu.matmul %133, %108, %cst_43 {dimension_numbers = #tpu.dot_dimension_numbers<[1], [0], [0], [1], [0, 0, 1, 1], [], []>} : vector<8x32xf32>, vector<32x128xf32>, vector<8x128xf32> -> vector<8x128xf32>
    %135 = arith.addf %102, %134 : vector<8x128xf32>
    %c4 = arith.constant 4 : index
    %c0_44 = arith.constant 0 : index
    %c0_45 = arith.constant 0 : index
    %136 = vector.load %arg1[%c4, %c0_44, %c0_45] : memref<8x8x128xf32, #tpu.memory_space<vmem>>, vector<1x8x128xf32>
    %137 = vector.shape_cast %136 : vector<1x8x128xf32> to vector<8x128xf32>
    %cst_46 = arith.constant dense<0.000000e+00> : vector<8x128xf32>
    %138 = tpu.matmul %133, %0, %cst_46 {dimension_numbers = #tpu.dot_dimension_numbers<[1], [0], [0], [1], [0, 0, 1, 1], [], []>} : vector<8x32xf32>, vector<32x128xf32>, vector<8x128xf32> -> vector<8x128xf32>
    %139 = arith.addf %137, %138 : vector<8x128xf32>
    %c4_47 = arith.constant 4 : index
    %c0_48 = arith.constant 0 : index
    %c0_49 = arith.constant 0 : index
    %140 = vector.load %arg3[%c4_47, %c0_48, %c0_49] : memref<8x32x128xf32, #tpu.memory_space<vmem>>, vector<1x32x128xf32>
    %141 = vector.shape_cast %140 : vector<1x32x128xf32> to vector<32x128xf32>
    %142 = vector.extract_strided_slice %139 {offsets = [0, 0], sizes = [8, 32], strides = [1, 1]} : vector<8x128xf32> to vector<8x32xf32>
    %143 = arith.negf %142 : vector<8x32xf32>
    %144 = math.exp %143 : vector<8x32xf32>
    %cst_50 = arith.constant 1.000000e+00 : f32
    %145 = vector.broadcast %cst_50 : f32 to vector<8x32xf32>
    %146 = arith.addf %145, %144 : vector<8x32xf32>
    %147 = arith.divf %145, %146 : vector<8x32xf32>
    %148 = vector.extract_strided_slice %139 {offsets = [0, 32], sizes = [8, 32], strides = [1, 1]} : vector<8x128xf32> to vector<8x32xf32>
    %149 = arith.negf %148 : vector<8x32xf32>
    %150 = math.exp %149 : vector<8x32xf32>
    %cst_51 = arith.constant 1.000000e+00 : f32
    %151 = vector.broadcast %cst_51 : f32 to vector<8x32xf32>
    %152 = arith.addf %151, %150 : vector<8x32xf32>
    %153 = arith.divf %151, %152 : vector<8x32xf32>
    %154 = vector.extract_strided_slice %139 {offsets = [0, 64], sizes = [8, 32], strides = [1, 1]} : vector<8x128xf32> to vector<8x32xf32>
    %155 = math.tanh %154 : vector<8x32xf32>
    %156 = vector.extract_strided_slice %139 {offsets = [0, 96], sizes = [8, 32], strides = [1, 1]} : vector<8x128xf32> to vector<8x32xf32>
    %157 = arith.negf %156 : vector<8x32xf32>
    %158 = math.exp %157 : vector<8x32xf32>
    %cst_52 = arith.constant 1.000000e+00 : f32
    %159 = vector.broadcast %cst_52 : f32 to vector<8x32xf32>
    %160 = arith.addf %159, %158 : vector<8x32xf32>
    %161 = arith.divf %159, %160 : vector<8x32xf32>
    %162 = arith.mulf %153, %131 : vector<8x32xf32>
    %163 = arith.mulf %147, %155 : vector<8x32xf32>
    %164 = arith.addf %162, %163 : vector<8x32xf32>
    %165 = math.tanh %164 : vector<8x32xf32>
    %166 = arith.mulf %161, %165 : vector<8x32xf32>
    %cst_53 = arith.constant dense<0.000000e+00> : vector<8x128xf32>
    %167 = tpu.matmul %166, %141, %cst_53 {dimension_numbers = #tpu.dot_dimension_numbers<[1], [0], [0], [1], [0, 0, 1, 1], [], []>} : vector<8x32xf32>, vector<32x128xf32>, vector<8x128xf32> -> vector<8x128xf32>
    %168 = arith.addf %135, %167 : vector<8x128xf32>
    %c5 = arith.constant 5 : index
    %c0_54 = arith.constant 0 : index
    %c0_55 = arith.constant 0 : index
    %169 = vector.load %arg1[%c5, %c0_54, %c0_55] : memref<8x8x128xf32, #tpu.memory_space<vmem>>, vector<1x8x128xf32>
    %170 = vector.shape_cast %169 : vector<1x8x128xf32> to vector<8x128xf32>
    %cst_56 = arith.constant dense<0.000000e+00> : vector<8x128xf32>
    %171 = tpu.matmul %166, %0, %cst_56 {dimension_numbers = #tpu.dot_dimension_numbers<[1], [0], [0], [1], [0, 0, 1, 1], [], []>} : vector<8x32xf32>, vector<32x128xf32>, vector<8x128xf32> -> vector<8x128xf32>
    %172 = arith.addf %170, %171 : vector<8x128xf32>
    %c5_57 = arith.constant 5 : index
    %c0_58 = arith.constant 0 : index
    %c0_59 = arith.constant 0 : index
    %173 = vector.load %arg3[%c5_57, %c0_58, %c0_59] : memref<8x32x128xf32, #tpu.memory_space<vmem>>, vector<1x32x128xf32>
    %174 = vector.shape_cast %173 : vector<1x32x128xf32> to vector<32x128xf32>
    %175 = vector.extract_strided_slice %172 {offsets = [0, 0], sizes = [8, 32], strides = [1, 1]} : vector<8x128xf32> to vector<8x32xf32>
    %176 = arith.negf %175 : vector<8x32xf32>
    %177 = math.exp %176 : vector<8x32xf32>
    %cst_60 = arith.constant 1.000000e+00 : f32
    %178 = vector.broadcast %cst_60 : f32 to vector<8x32xf32>
    %179 = arith.addf %178, %177 : vector<8x32xf32>
    %180 = arith.divf %178, %179 : vector<8x32xf32>
    %181 = vector.extract_strided_slice %172 {offsets = [0, 32], sizes = [8, 32], strides = [1, 1]} : vector<8x128xf32> to vector<8x32xf32>
    %182 = arith.negf %181 : vector<8x32xf32>
    %183 = math.exp %182 : vector<8x32xf32>
    %cst_61 = arith.constant 1.000000e+00 : f32
    %184 = vector.broadcast %cst_61 : f32 to vector<8x32xf32>
    %185 = arith.addf %184, %183 : vector<8x32xf32>
    %186 = arith.divf %184, %185 : vector<8x32xf32>
    %187 = vector.extract_strided_slice %172 {offsets = [0, 64], sizes = [8, 32], strides = [1, 1]} : vector<8x128xf32> to vector<8x32xf32>
    %188 = math.tanh %187 : vector<8x32xf32>
    %189 = vector.extract_strided_slice %172 {offsets = [0, 96], sizes = [8, 32], strides = [1, 1]} : vector<8x128xf32> to vector<8x32xf32>
    %190 = arith.negf %189 : vector<8x32xf32>
    %191 = math.exp %190 : vector<8x32xf32>
    %cst_62 = arith.constant 1.000000e+00 : f32
    %192 = vector.broadcast %cst_62 : f32 to vector<8x32xf32>
    %193 = arith.addf %192, %191 : vector<8x32xf32>
    %194 = arith.divf %192, %193 : vector<8x32xf32>
    %195 = arith.mulf %186, %164 : vector<8x32xf32>
    %196 = arith.mulf %180, %188 : vector<8x32xf32>
    %197 = arith.addf %195, %196 : vector<8x32xf32>
    %198 = math.tanh %197 : vector<8x32xf32>
    %199 = arith.mulf %194, %198 : vector<8x32xf32>
    %cst_63 = arith.constant dense<0.000000e+00> : vector<8x128xf32>
    %200 = tpu.matmul %199, %174, %cst_63 {dimension_numbers = #tpu.dot_dimension_numbers<[1], [0], [0], [1], [0, 0, 1, 1], [], []>} : vector<8x32xf32>, vector<32x128xf32>, vector<8x128xf32> -> vector<8x128xf32>
    %201 = arith.addf %168, %200 : vector<8x128xf32>
    %c6 = arith.constant 6 : index
    %c0_64 = arith.constant 0 : index
    %c0_65 = arith.constant 0 : index
    %202 = vector.load %arg1[%c6, %c0_64, %c0_65] : memref<8x8x128xf32, #tpu.memory_space<vmem>>, vector<1x8x128xf32>
    %203 = vector.shape_cast %202 : vector<1x8x128xf32> to vector<8x128xf32>
    %cst_66 = arith.constant dense<0.000000e+00> : vector<8x128xf32>
    %204 = tpu.matmul %199, %0, %cst_66 {dimension_numbers = #tpu.dot_dimension_numbers<[1], [0], [0], [1], [0, 0, 1, 1], [], []>} : vector<8x32xf32>, vector<32x128xf32>, vector<8x128xf32> -> vector<8x128xf32>
    %205 = arith.addf %203, %204 : vector<8x128xf32>
    %c6_67 = arith.constant 6 : index
    %c0_68 = arith.constant 0 : index
    %c0_69 = arith.constant 0 : index
    %206 = vector.load %arg3[%c6_67, %c0_68, %c0_69] : memref<8x32x128xf32, #tpu.memory_space<vmem>>, vector<1x32x128xf32>
    %207 = vector.shape_cast %206 : vector<1x32x128xf32> to vector<32x128xf32>
    %208 = vector.extract_strided_slice %205 {offsets = [0, 0], sizes = [8, 32], strides = [1, 1]} : vector<8x128xf32> to vector<8x32xf32>
    %209 = arith.negf %208 : vector<8x32xf32>
    %210 = math.exp %209 : vector<8x32xf32>
    %cst_70 = arith.constant 1.000000e+00 : f32
    %211 = vector.broadcast %cst_70 : f32 to vector<8x32xf32>
    %212 = arith.addf %211, %210 : vector<8x32xf32>
    %213 = arith.divf %211, %212 : vector<8x32xf32>
    %214 = vector.extract_strided_slice %205 {offsets = [0, 32], sizes = [8, 32], strides = [1, 1]} : vector<8x128xf32> to vector<8x32xf32>
    %215 = arith.negf %214 : vector<8x32xf32>
    %216 = math.exp %215 : vector<8x32xf32>
    %cst_71 = arith.constant 1.000000e+00 : f32
    %217 = vector.broadcast %cst_71 : f32 to vector<8x32xf32>
    %218 = arith.addf %217, %216 : vector<8x32xf32>
    %219 = arith.divf %217, %218 : vector<8x32xf32>
    %220 = vector.extract_strided_slice %205 {offsets = [0, 64], sizes = [8, 32], strides = [1, 1]} : vector<8x128xf32> to vector<8x32xf32>
    %221 = math.tanh %220 : vector<8x32xf32>
    %222 = vector.extract_strided_slice %205 {offsets = [0, 96], sizes = [8, 32], strides = [1, 1]} : vector<8x128xf32> to vector<8x32xf32>
    %223 = arith.negf %222 : vector<8x32xf32>
    %224 = math.exp %223 : vector<8x32xf32>
    %cst_72 = arith.constant 1.000000e+00 : f32
    %225 = vector.broadcast %cst_72 : f32 to vector<8x32xf32>
    %226 = arith.addf %225, %224 : vector<8x32xf32>
    %227 = arith.divf %225, %226 : vector<8x32xf32>
    %228 = arith.mulf %219, %197 : vector<8x32xf32>
    %229 = arith.mulf %213, %221 : vector<8x32xf32>
    %230 = arith.addf %228, %229 : vector<8x32xf32>
    %231 = math.tanh %230 : vector<8x32xf32>
    %232 = arith.mulf %227, %231 : vector<8x32xf32>
    %cst_73 = arith.constant dense<0.000000e+00> : vector<8x128xf32>
    %233 = tpu.matmul %232, %207, %cst_73 {dimension_numbers = #tpu.dot_dimension_numbers<[1], [0], [0], [1], [0, 0, 1, 1], [], []>} : vector<8x32xf32>, vector<32x128xf32>, vector<8x128xf32> -> vector<8x128xf32>
    %234 = arith.addf %201, %233 : vector<8x128xf32>
    %c7 = arith.constant 7 : index
    %c0_74 = arith.constant 0 : index
    %c0_75 = arith.constant 0 : index
    %235 = vector.load %arg1[%c7, %c0_74, %c0_75] : memref<8x8x128xf32, #tpu.memory_space<vmem>>, vector<1x8x128xf32>
    %236 = vector.shape_cast %235 : vector<1x8x128xf32> to vector<8x128xf32>
    %cst_76 = arith.constant dense<0.000000e+00> : vector<8x128xf32>
    %237 = tpu.matmul %232, %0, %cst_76 {dimension_numbers = #tpu.dot_dimension_numbers<[1], [0], [0], [1], [0, 0, 1, 1], [], []>} : vector<8x32xf32>, vector<32x128xf32>, vector<8x128xf32> -> vector<8x128xf32>
    %238 = arith.addf %236, %237 : vector<8x128xf32>
    %c7_77 = arith.constant 7 : index
    %c0_78 = arith.constant 0 : index
    %c0_79 = arith.constant 0 : index
    %239 = vector.load %arg3[%c7_77, %c0_78, %c0_79] : memref<8x32x128xf32, #tpu.memory_space<vmem>>, vector<1x32x128xf32>
    %240 = vector.shape_cast %239 : vector<1x32x128xf32> to vector<32x128xf32>
    %241 = vector.extract_strided_slice %238 {offsets = [0, 0], sizes = [8, 32], strides = [1, 1]} : vector<8x128xf32> to vector<8x32xf32>
    %242 = arith.negf %241 : vector<8x32xf32>
    %243 = math.exp %242 : vector<8x32xf32>
    %cst_80 = arith.constant 1.000000e+00 : f32
    %244 = vector.broadcast %cst_80 : f32 to vector<8x32xf32>
    %245 = arith.addf %244, %243 : vector<8x32xf32>
    %246 = arith.divf %244, %245 : vector<8x32xf32>
    %247 = vector.extract_strided_slice %238 {offsets = [0, 32], sizes = [8, 32], strides = [1, 1]} : vector<8x128xf32> to vector<8x32xf32>
    %248 = arith.negf %247 : vector<8x32xf32>
    %249 = math.exp %248 : vector<8x32xf32>
    %cst_81 = arith.constant 1.000000e+00 : f32
    %250 = vector.broadcast %cst_81 : f32 to vector<8x32xf32>
    %251 = arith.addf %250, %249 : vector<8x32xf32>
    %252 = arith.divf %250, %251 : vector<8x32xf32>
    %253 = vector.extract_strided_slice %238 {offsets = [0, 64], sizes = [8, 32], strides = [1, 1]} : vector<8x128xf32> to vector<8x32xf32>
    %254 = math.tanh %253 : vector<8x32xf32>
    %255 = vector.extract_strided_slice %238 {offsets = [0, 96], sizes = [8, 32], strides = [1, 1]} : vector<8x128xf32> to vector<8x32xf32>
    %256 = arith.negf %255 : vector<8x32xf32>
    %257 = math.exp %256 : vector<8x32xf32>
    %cst_82 = arith.constant 1.000000e+00 : f32
    %258 = vector.broadcast %cst_82 : f32 to vector<8x32xf32>
    %259 = arith.addf %258, %257 : vector<8x32xf32>
    %260 = arith.divf %258, %259 : vector<8x32xf32>
    %261 = arith.mulf %252, %230 : vector<8x32xf32>
    %262 = arith.mulf %246, %254 : vector<8x32xf32>
    %263 = arith.addf %261, %262 : vector<8x32xf32>
    %264 = math.tanh %263 : vector<8x32xf32>
    %265 = arith.mulf %260, %264 : vector<8x32xf32>
    %cst_83 = arith.constant dense<0.000000e+00> : vector<8x128xf32>
    %266 = tpu.matmul %265, %240, %cst_83 {dimension_numbers = #tpu.dot_dimension_numbers<[1], [0], [0], [1], [0, 0, 1, 1], [], []>} : vector<8x32xf32>, vector<32x128xf32>, vector<8x128xf32> -> vector<8x128xf32>
    %267 = arith.addf %234, %266 : vector<8x128xf32>
    %c0_84 = arith.constant 0 : index
    %c0_85 = arith.constant 0 : index
    %268 = vector.load %arg4[%c0_84, %c0_85] : memref<1x128xf32, #tpu.memory_space<vmem>>, vector<1x128xf32>
    %269 = vector.broadcast %268 : vector<1x128xf32> to vector<8x128xf32>
    %270 = arith.addf %267, %269 : vector<8x128xf32>
    %c0_86 = arith.constant 0 : index
    %c0_87 = arith.constant 0 : index
    %271 = vector.load %arg5[%c0_86, %c0_87] : memref<8x128xf32, #tpu.memory_space<vmem>>, vector<8x128xf32>
    tpu.vector_store %arg5[%c0_86, %c0_87], %270 {strides = array<i32>} : memref<8x128xf32, #tpu.memory_space<vmem>>, vector<8x128xf32>,
    return
  }
  func.func @transform_0(%arg0: i32) -> (i32, i32, i32) {
    %c0_i32 = arith.constant 0 : i32
    %c0_i32_0 = arith.constant 0 : i32
    %c0_i32_1 = arith.constant 0 : i32
    return %c0_i32, %arg0, %c0_i32_0 : i32, i32, i32
  }
  func.func @transform_1(%arg0: i32) -> (i32, i32) {
    %c0_i32 = arith.constant 0 : i32
    %c0_i32_0 = arith.constant 0 : i32
    %c0_i32_1 = arith.constant 0 : i32
    return %c0_i32, %c0_i32_0 : i32, i32
  }
  func.func @transform_2(%arg0: i32) -> (i32, i32, i32) {
    %c0_i32 = arith.constant 0 : i32
    %c0_i32_0 = arith.constant 0 : i32
    %c0_i32_1 = arith.constant 0 : i32
    %c0_i32_2 = arith.constant 0 : i32
    return %c0_i32, %c0_i32_0, %c0_i32_1 : i32, i32, i32
  }
  func.func @transform_3(%arg0: i32) -> (i32, i32) {
    %c0_i32 = arith.constant 0 : i32
    %c0_i32_0 = arith.constant 0 : i32
    %c0_i32_1 = arith.constant 0 : i32
    return %c0_i32, %c0_i32_0 : i32, i32
  }
  func.func @transform_4(%arg0: i32) -> (i32, i32) {
    %c0_i32 = arith.constant 0 : i32
    %c0_i32_0 = arith.constant 0 : i32
    return %arg0, %c0_i32 : i32, i32
  }
}

</mosaic_0001>

<bundles_post_ra>
// kernel: tpu_custom_call.1
= control target key start
LH: loop header
LB: loop body
LE: loop exit
PB: predicated region body
PF: predicated region fallthrough
CT: control target
= control target key end

     0   :  { %9 = vsyncpa [#allocation3], 0  ;;  %s2340_s0 = inlined_call_operand.hbm [shape: f32[8,8,128], index: 0, kind: input, shape index: {}]   ;;  %s2341_s1 = inlined_call_operand.hbm [shape: f32[32,128], index: 1, kind: input, shape index: {}]   ;;  %s2342_s2 = inlined_call_operand.hbm [shape: f32[8,32,128], index: 2, kind: input, shape index: {}]   ;;  %s2343_s3 = inlined_call_operand.hbm [shape: f32[1,128], index: 3, kind: input, shape index: {}]   ;;  %s2344_s4 = inlined_call_operand.hbm [shape: f32[8,128], index: 4, kind: output, shape index: {}]  }
   0x1   :  { %10 = vsyncpa [#allocation6], 0 }
   0x2   :  { %11 = vsyncpa [#allocation9], 0 }
   0x3   :  { %12 = vsyncpa [#allocation4], 0  ;;  %s2095_s15 = smov [#allocation5]   ;;  %s2096_s17 = smov [#allocation2]  }
   0x4   :  { %s30_s16 = sshll.u32 %s2095_s15, 4  ;;  %s18_s18 = sshll.u32 %s2096_s17, 4  ;;  %s31_s16 = int_to_ptr.vmem [resolvable:$true] %s30_s16  ;;  %s2132_s18 = int_to_ptr.vmem [resolvable:$true] %s18_s18 }
   0x5   :  { %s1977_s21 = scalar_lea.hbm %s2341_s1, 512 }
   0x6   :  { %p1978_p0 = scmp.ne.s32.totalorder %s2341_s1, %s1977_s21  ;;  %p1981_p1 = scmp.lt.u32.totalorder %s1977_s21, %s2341_s1 }
   0x8   :  { %p1983_p2 = pnand %p1981_p1, %p1978_p0 }
   0xa   :  { %1986 = shalt.err (!%p1983_p2)
}
   0xb   :  { %s1987_s26 = scalar_lea.vmem %s31_s16, 512  ;;  %p1992_p4 = scmp.lt.s32.totalorder %s31_s16, %s31_s16 }
   0xc   :  { %p1988_p3 = scmp.ne.s32.totalorder %s31_s16, %s1987_s26  ;;  %p1993_p5 = scmp.lt.s32.totalorder %s1987_s26, %s1987_s26 }
   0xe   :  { %p1994_p6 = por %p1993_p5, %p1992_p4 }
  0x10   :  { %p1995_p7 = pnand %p1994_p6, %p1988_p3 }
  0x12   :  { %1998 = shalt.err (!%p1995_p7)
}
  0x13   :  { %s2097_s27 = smov 128   ;;  %s2098_s28 = smov 8  }
  0x14   :  { %36 = dma.hbm_to_vmem [thread:$0]  %s2341_s1, 512, %s31_s16, [#allocation6], %s2097_s27, %s2097_s27, %s2098_s28  }
  0x15   :  { %s1999_s7 = scalar_lea.hbm %s2340_s0, 1024 }
  0x16   :  { %p2000_p8 = scmp.ne.s32.totalorder %s2340_s0, %s1999_s7  ;;  %p2003_p9 = scmp.lt.u32.totalorder %s1999_s7, %s2340_s0 }
  0x18   :  { %p2005_p10 = pnand %p2003_p9, %p2000_p8 }
  0x1a   :  { %2008 = shalt.err (!%p2005_p10)
}
  0x1b   :  { %s2009_s12 = scalar_lea.vmem %s2132_s18, 1024  ;;  %p2014_p12 = scmp.lt.s32.totalorder %s2132_s18, %s2132_s18 }
  0x1c   :  { %p2010_p11 = scmp.ne.s32.totalorder %s2132_s18, %s2009_s12  ;;  %p2015_p13 = scmp.lt.s32.totalorder %s2009_s12, %s2009_s12 }
  0x1e   :  { %p2016_p0 = por %p2015_p13, %p2014_p12 }
  0x20   :  { %p2017_p1 = pnand %p2016_p0, %p2010_p11 }
  0x22   :  { %2020 = shalt.err (!%p2017_p1)
}
  0x23   :  { %24 = dma.hbm_to_vmem [thread:$0]  %s2340_s0, 1024, %s2132_s18, [#allocation3], %s2097_s27, %s2097_s27, %s2098_s28  }
  0x24   :  { %s2099_s14 = smov [#allocation7]   ;;  %s2100_s16 = smov [#allocation8]  }
  0x25   :  { %s42_s15 = sshll.u32 %s2099_s14, 4  ;;  %s55_s17 = sshll.u32 %s2100_s16, 4  ;;  %s43_s15 = int_to_ptr.vmem [resolvable:$true] %s42_s15  ;;  %s56_s17 = int_to_ptr.vmem [resolvable:$true] %s55_s17 }
  0x26   :  { %s2021_s21 = scalar_lea.hbm %s2342_s2, 4096 }
  0x27   :  { %p2022_p2 = scmp.ne.s32.totalorder %s2342_s2, %s2021_s21  ;;  %p2025_p3 = scmp.lt.u32.totalorder %s2021_s21, %s2342_s2 }
  0x29   :  { %p2027_p4 = pnand %p2025_p3, %p2022_p2 }
  0x2b   :  { %2030 = shalt.err (!%p2027_p4)
}
  0x2c   :  { %s2031_s0 = scalar_lea.vmem %s43_s15, 4096  ;;  %p2036_p6 = scmp.lt.s32.totalorder %s43_s15, %s43_s15 }
  0x2d   :  { %p2032_p5 = scmp.ne.s32.totalorder %s43_s15, %s2031_s0  ;;  %p2037_p7 = scmp.lt.s32.totalorder %s2031_s0, %s2031_s0 }
  0x2f   :  { %p2038_p8 = por %p2037_p7, %p2036_p6 }
  0x31   :  { %p2039_p9 = pnand %p2038_p8, %p2032_p5 }
  0x33   :  { %2042 = shalt.err (!%p2039_p9)
}
  0x34   :  { %48 = dma.hbm_to_vmem [thread:$0]  %s2342_s2, 4096, %s43_s15, [#allocation6], %s2097_s27, %s2097_s27, %s2098_s28  }
  0x35   :  { %s2043_s5 = scalar_lea.hbm %s2343_s3, 16 }
  0x36   :  { %p2044_p10 = scmp.ne.s32.totalorder %s2343_s3, %s2043_s5  ;;  %p2047_p11 = scmp.lt.u32.totalorder %s2043_s5, %s2343_s3 }
  0x38   :  { %p2049_p12 = pnand %p2047_p11, %p2044_p10 }
  0x3a   :  { %2052 = shalt.err (!%p2049_p12)
}
  0x3b   :  { %s2053_s10 = scalar_lea.vmem %s56_s17, 16  ;;  %s2057_s11 = scalar_lea.vmem %s56_s17, 32 }
  0x3c   :  { %p2054_p13 = scmp.ne.s32.totalorder %s56_s17, %s2053_s10  ;;  %p2058_p0 = scmp.lt.s32.totalorder %s56_s17, %s56_s17 }
  0x3d   :  { %p2059_p1 = scmp.lt.s32.totalorder %s2057_s11, %s2053_s10 }
  0x3f   :  { %p2060_p2 = por %p2059_p1, %p2058_p0 }
  0x41   :  { %p2061_p3 = pnand %p2060_p2, %p2054_p13 }
  0x43   :  { %2064 = shalt.err (!%p2061_p3)
}
  0x44   :  { %58 = dma.hbm_to_vmem [thread:$0]  %s2343_s3, 16, %s56_s17, [#allocation9]  }
  0x45   :  { %2087 = dma.done.wait [#allocation3], 1024  }
  0x46   :  { %2088 = vsyncadd [#allocation3], 4294966272 }
  0x47   :  { %2089 = dma.done.wait [#allocation6], 4608  }
  0x48   :  { %2090 = vsyncadd [#allocation6], 4294962688 }
  0x49   :  { %2091 = dma.done.wait [#allocation9], 16  }
  0x4a   :  { %2092 = vsyncadd [#allocation9], 4294967280  ;;  %v2101_v0 = vmov 0.0|0.0   ;;  %vm2102_vm0 = vmmov 0   ;;  %v2103_v1 = vmov 0.0   ;;  %v71_v2 = vld [vmem:[#allocation5] sm:$0xff] }
  0x4b   :  { %1805 = vmatprep.subr.bf16.mxu0 %v2101_v0  ;;  %1637 = vmatprep.mubr.msk.f32.mxu0 %vm2102_vm0, %v2103_v1  ;;  %v72_v3 = vld [vmem:[#allocation5 + $0x8] sm:$0xff]  ;;  %v73_v4 = vld [vmem:[#allocation5 + $0x10] sm:$0xff]  ;;  %v74_v6 = vld [vmem:[#allocation5 + $0x18] sm:$0xff]  ;;  %s2104_s3 = smov 64   ;;  %s2105_s28 = smov 32   ;;  %vm76_vm1 = vcmask 261120  }
  0x4c   :  { %1811 = vmatprep.subr.bf16.mxu1 %v2101_v0  ;;  %1648 = vmatprep.mubr.msk.f32.mxu1 %vm2102_vm0, %v2103_v1  ;;  %v2202_v5 = vpack.c.bf16 %v72_v3, %v71_v2  ;;  %v2205_v7 = vpack.c.bf16 %v74_v6, %v73_v4  ;;  %v75_v8 = vld [vmem:[#allocation2] sm:$0xff]  ;;  %v152_v26 = vld [vmem:[#allocation7 + $0x8] sm:$0xff]  ;;  %v153_v28 = vld [vmem:[#allocation7 + $0x10] sm:$0xff]  ;;  %s2106_s12 = smov [#allocation10]  }
  0x4d   :  { %v151_v25 = vld [vmem:[#allocation7] sm:$0xff]  ;;  %v154_v29 = vld [vmem:[#allocation7 + $0x18] sm:$0xff]  ;;  %v180_v32 = vld [vmem:[#allocation2 + $0x8] sm:$0xff]  ;;  %s1514_s1 = sshll.u32 %s2106_s12, 4  ;;  %s1515_s1 = int_to_ptr.vmem [resolvable:$true] %s1514_s1 }
  0x4e   :  { %1807 = vmatpush3.bf16.msra.mxu0 %v2202_v5  ;;  %1813 = vmatpush3.bf16.msra.mxu1 %v2202_v5  ;;  %v1824_v27 = vpack.c.bf16 %v152_v26, %v151_v25  ;;  %v1827_v31 = vpack.c.bf16 %v154_v29, %v153_v28  ;;  %v258_v48 = vld [vmem:[#allocation7 + $0x20] sm:$0xff]  ;;  %v259_v49 = vld [vmem:[#allocation7 + $0x28] sm:$0xff]  ;;  %v260_v50 = vld [vmem:[#allocation7 + $0x30] sm:$0xff]  ;;  %s2065_s13 = scalar_lea.vmem %s1515_s1, 128  ;;  %p2070_p5 = scmp.lt.s32.totalorder %s1515_s1, %s1515_s1 }
  0x4f   :  { %1808 = vmatprep.subr.bf16.mxu0 %v2101_v0  ;;  %1814 = vmatprep.subr.bf16.mxu1 %v2101_v0  ;;  %v1818_v51 = vpack.c.bf16 %v259_v49, %v258_v48  ;;  %v261_v52 = vld [vmem:[#allocation7 + $0x38] sm:$0xff]  ;;  %v432_v61 = vld [vmem:[#allocation2 + $0x10] sm:$0xff]  ;;  %p2066_p4 = scmp.ne.s32.totalorder %s1515_s1, %s2065_s13  ;;  %p2071_p6 = scmp.lt.s32.totalorder %s2065_s13, %s2065_s13 }
  0x50   :  { %v1821_v53 = vpack.c.bf16 %v261_v52, %v260_v50  ;;  %v610_v25 = vld [vmem:[#allocation2 + $0x18] sm:$0xff]  ;;  %v788_v52 = vld [vmem:[#allocation2 + $0x20] sm:$0xff] }
  0x51   :  { %p2072_p7 = por %p2071_p6, %p2070_p5 }
  0x52   :  { %1810 = vmatpush3.bf16.msra.mxu0 %v2205_v7  ;;  %1816 = vmatpush3.bf16.msra.mxu1 %v2205_v7 }
  0x53   :  { %1823 = vmatprep.subr.bf16.mxu1 %v2101_v0  ;;  %1817 = vmatprep.subr.bf16.mxu0 %v2101_v0  ;;  %p2073_p8 = pnand %p2072_p7, %p2066_p4 }
  0x55   :  { %1638 = vmatmul.mubr.f32.vlgmr.msra.gmra.mrb[0].mxu0 %v2103_v1 }
  0x56   :  { %1659 = vmatprep.mubr.msk.f32.mxu0 %vm2102_vm0, %v2103_v1  ;;  %1819 = vmatpush3.bf16.msra.mxu0 %v1818_v51 }
  0x57   :  { %1820 = vmatprep.subr.bf16.mxu0 %v2101_v0 }
  0x5a   :  { %1822 = vmatpush3.bf16.msra.mxu0 %v1821_v53 }
  0x5b   :  { %1829 = vmatprep.subr.bf16.mxu0 %v2101_v0 }
 0x128   :  { %v146_v9 = vpop.f32.mrb[0].mxu0 }
 0x129   :  { %v150_v10 = vadd.f32 %v146_v9, %v75_v8  ;;  %v1639_v11 = vpop.f32.mrb[1].mxu0 }
 0x12b   :  { %1913 = vtanh.f32 %v150_v10  ;;  %v1525_v13 = vmul.f32 -1.442695, %v150_v10 }
 0x12d   :  { %1915 = vpow2.f32 %v1525_v13 }
 0x135   :  { %v1914_v12 = vpop.eup %1913 }
 0x136   :  { %164 = vrot.lane.b32.xlu0 %v1914_v12, %s2104_s3 }
 0x137   :  { %v1916_v14 = vpop.eup %1915 }
 0x138   :  { %v158_v15 = vadd.f32 1.0, %v1916_v14 }
 0x13a   :  { %1917 = vrcp.f32 %v158_v15  ;;  %v505_v15 = vld [vmem:[#allocation7 + $0x40] sm:$0xff] }
 0x144   :  { %v1918_v16 = vpop.eup %1917 }
 0x145   :  { %v162_v19 = vmul.f32 0.0, %v1918_v16 }
 0x1a8   :  { %v165_v17 = vpop.permute.xlu0 %164 }
 0x1a9   :  { %v167_v18 = vmul.f32 %v1918_v16, %v165_v17  ;;  %v507_v17 = vld [vmem:[#allocation7 + $0x50] sm:$0xff] }
 0x1ab   :  { %169 = vrot.lane.b32.xlu0 %v167_v18, %s2105_s28 }
 0x21d   :  { %v170_v20 = vpop.permute.xlu0 %169 }
 0x21e   :  { %v172_v21 = vadd.f32 %v170_v20, %v162_v19  ;;  %v508_v19 = vld [vmem:[#allocation7 + $0x58] sm:$0xff] }
 0x21f   :  { %v1839_v20 = vpack.c.bf16 %v508_v19, %v507_v17  ;;  %v966_v19 = vld [vmem:[#allocation2 + $0x28] sm:$0xff] }
 0x220   :  { %1919 = vtanh.f32 %v172_v21 }
 0x22a   :  { %v1920_v22 = vpop.eup %1919 }
 0x22b   :  { %175 = vrot.lane.b32.xlu1 %v1920_v22, %s2104_s3 }
 0x29d   :  { %v176_v23 = vpop.permute.xlu1 %175 }
 0x29e   :  { %v178_v24 = vmul.f32 %v1918_v16, %v176_v23  ;;  %v506_v16 = vld [vmem:[#allocation7 + $0x48] sm:$0xff] }
 0x29f   :  { %v1836_v18 = vpack.c.bf16 %v506_v16, %v505_v15 }
 0x2a0   :  { %182 = vrot.lane.b32.xlu1 %v178_v24, %s2105_s28 }
 0x312   :  { %v183_v30 = vpop.permute.xlu1 %182 }
 0x313   :  { %1649 = vmatmul.mubr.msk.f32.vlgmr.msra.gmra.mrb[0].mxu1 %vm76_vm1, %v183_v30 }
 0x314   :  { %1825 = vmatpush3.bf16.msra.mxu1 %v1824_v27  ;;  %1670 = vmatprep.mubr.msk.f32.mxu1 %vm2102_vm0, %v2103_v1 }
 0x315   :  { %1826 = vmatprep.subr.bf16.mxu1 %v2101_v0 }
 0x318   :  { %1828 = vmatpush3.bf16.msra.mxu1 %v1827_v31 }
 0x319   :  { %1835 = vmatprep.subr.bf16.mxu1 %v2101_v0 }
 0x31b   :  { %1671 = vmatmul.mubr.msk.f32.vlgmr.msra.gmra.mrb[2].mxu1 %vm76_vm1, %v183_v30 }
 0x31c   :  { %1692 = vmatprep.mubr.msk.f32.mxu1 %vm2102_vm0, %v2103_v1  ;;  %1837 = vmatpush3.bf16.msra.mxu1 %v1836_v18 }
 0x31d   :  { %1838 = vmatprep.subr.bf16.mxu1 %v2101_v0 }
 0x320   :  { %1840 = vmatpush3.bf16.msra.mxu1 %v1839_v20 }
 0x321   :  { %1847 = vmatprep.subr.bf16.mxu1 %v2101_v0 }
 0x3e6   :  { %v252_v33 = vpop.f32.mrb[0].mxu1 }
 0x3e7   :  { %v256_v34 = vadd.f32 %v252_v33, %v180_v32  ;;  %v1650_v35 = vpop.f32.mrb[1].mxu1 }
 0x3e9   :  { %1921 = vtanh.f32 %v256_v34  ;;  %v1527_v39 = vmul.f32 -1.442695, %v256_v34 }
 0x3eb   :  { %1923 = vpow2.f32 %v1527_v39 }
 0x3ee   :  { %v427_v36 = vpop.f32.mrb[2].mxu1 }
 0x3ef   :  { %v1672_v37 = vpop.f32.mrb[3].mxu1 }
 0x3f3   :  { %v1922_v38 = vpop.eup %1921 }
 0x3f4   :  { %271 = vrot.lane.b32.xlu0 %v1922_v38, %s2104_s3 }
 0x3f5   :  { %v1924_v40 = vpop.eup %1923 }
 0x3f6   :  { %v265_v41 = vadd.f32 1.0, %v1924_v40 }
 0x3f8   :  { %1925 = vrcp.f32 %v265_v41 }
 0x402   :  { %v1926_v42 = vpop.eup %1925 }
 0x403   :  { %v269_v45 = vmul.f32 %v1926_v42, %v172_v21 }
 0x466   :  { %v272_v43 = vpop.permute.xlu0 %271 }
 0x467   :  { %v274_v44 = vmul.f32 %v1926_v42, %v272_v43  ;;  %v684_v43 = vld [vmem:[#allocation7 + $0x68] sm:$0xff] }
 0x469   :  { %276 = vrot.lane.b32.xlu1 %v274_v44, %s2105_s28  ;;  %v685_v44 = vld [vmem:[#allocation7 + $0x70] sm:$0xff] }
 0x4db   :  { %v277_v46 = vpop.permute.xlu1 %276 }
 0x4dc   :  { %v279_v47 = vadd.f32 %v277_v46, %v269_v45  ;;  %v686_v46 = vld [vmem:[#allocation7 + $0x78] sm:$0xff] }
 0x4de   :  { %1927 = vtanh.f32 %v279_v47 }
 0x4e8   :  { %v1928_v54 = vpop.eup %1927 }
 0x4e9   :  { %282 = vrot.lane.b32.xlu0 %v1928_v54, %s2104_s3 }
 0x55b   :  { %v283_v55 = vpop.permute.xlu0 %282 }
 0x55c   :  { %v285_v56 = vmul.f32 %v1926_v42, %v283_v55  ;;  %v683_v42 = vld [vmem:[#allocation7 + $0x60] sm:$0xff] }
 0x55d   :  { %v1848_v45 = vpack.c.bf16 %v684_v43, %v683_v42 }
 0x55e   :  { %287 = vrot.lane.b32.xlu1 %v285_v56, %s2105_s28 }
 0x5d0   :  { %v288_v57 = vpop.permute.xlu1 %287 }
 0x5d1   :  { %1660 = vmatmul.mubr.msk.f32.vlgmr.msra.gmra.mrb[2].mxu0 %vm76_vm1, %v288_v57 }
 0x5d2   :  { %1831 = vmatpush3.bf16.msra.mxu0 %v2202_v5  ;;  %1681 = vmatprep.mubr.msk.f32.mxu0 %vm2102_vm0, %v2103_v1 }
 0x5d3   :  { %1832 = vmatprep.subr.bf16.mxu0 %v2101_v0 }
 0x5d6   :  { %1834 = vmatpush3.bf16.msra.mxu0 %v2205_v7 }
 0x5d7   :  { %1841 = vmatprep.subr.bf16.mxu0 %v2101_v0 }
 0x5d9   :  { %1682 = vmatmul.mubr.msk.f32.vlgmr.msra.gmra.mrb[4].mxu0 %vm76_vm1, %v288_v57 }
 0x5da   :  { %1843 = vmatpush3.bf16.msra.mxu0 %v2202_v5  ;;  %1703 = vmatprep.mubr.msk.f32.mxu0 %vm2102_vm0, %v2103_v1 }
 0x5db   :  { %1844 = vmatprep.subr.bf16.mxu0 %v2101_v0 }
 0x5de   :  { %1846 = vmatpush3.bf16.msra.mxu0 %v2205_v7 }
 0x5df   :  { %1853 = vmatprep.subr.bf16.mxu0 %v2101_v0 }
 0x6a4   :  { %v357_v58 = vpop.f32.mrb[2].mxu0 }
 0x6a5   :  { %v428_v59 = vadd.f32 %v427_v36, %v357_v58  ;;  %v1661_v60 = vpop.f32.mrb[3].mxu0 }
 0x6ac   :  { %v499_v62 = vpop.f32.mrb[4].mxu0 }
 0x6ad   :  { %v503_v63 = vadd.f32 %v499_v62, %v432_v61  ;;  %v1683_v2 = vpop.f32.mrb[5].mxu0 }
 0x6af   :  { %1929 = vtanh.f32 %v503_v63  ;;  %v1531_v4 = vmul.f32 -1.442695, %v503_v63 }
 0x6b1   :  { %1931 = vpow2.f32 %v1531_v4 }
 0x6b9   :  { %v1930_v3 = vpop.eup %1929 }
 0x6ba   :  { %518 = vrot.lane.b32.xlu0 %v1930_v3, %s2104_s3 }
 0x6bb   :  { %v1932_v6 = vpop.eup %1931 }
 0x6bc   :  { %v512_v8 = vadd.f32 1.0, %v1932_v6 }
 0x6be   :  { %1933 = vrcp.f32 %v512_v8 }
 0x6c8   :  { %v1934_v9 = vpop.eup %1933 }
 0x6c9   :  { %v516_v12 = vmul.f32 %v1934_v9, %v279_v47  ;;  %v1851_v47 = vpack.c.bf16 %v686_v46, %v685_v44  ;;  %v1144_v46 = vld [vmem:[#allocation2 + $0x30] sm:$0xff] }
 0x72c   :  { %v519_v10 = vpop.permute.xlu0 %518 }
 0x72d   :  { %v521_v11 = vmul.f32 %v1934_v9, %v519_v10  ;;  %v862_v10 = vld [vmem:[#allocation7 + $0x88] sm:$0xff] }
 0x72f   :  { %523 = vrot.lane.b32.xlu1 %v521_v11, %s2105_s28  ;;  %v863_v11 = vld [vmem:[#allocation7 + $0x90] sm:$0xff] }
 0x7a1   :  { %v524_v13 = vpop.permute.xlu1 %523 }
 0x7a2   :  { %v526_v14 = vadd.f32 %v524_v13, %v516_v12  ;;  %v864_v13 = vld [vmem:[#allocation7 + $0x98] sm:$0xff] }
 0x7a4   :  { %1935 = vtanh.f32 %v526_v14 }
 0x7ae   :  { %v1936_v21 = vpop.eup %1935 }
 0x7af   :  { %529 = vrot.lane.b32.xlu0 %v1936_v21, %s2104_s3 }
 0x821   :  { %v530_v22 = vpop.permute.xlu0 %529 }
 0x822   :  { %v532_v23 = vmul.f32 %v1934_v9, %v530_v22  ;;  %v861_v9 = vld [vmem:[#allocation7 + $0x80] sm:$0xff] }
 0x823   :  { %v1860_v12 = vpack.c.bf16 %v862_v10, %v861_v9 }
 0x824   :  { %534 = vrot.lane.b32.xlu1 %v532_v23, %s2105_s28 }
 0x896   :  { %v535_v24 = vpop.permute.xlu1 %534 }
 0x897   :  { %1693 = vmatmul.mubr.msk.f32.vlgmr.msra.gmra.mrb[4].mxu1 %vm76_vm1, %v535_v24  ;;  %1704 = vmatmul.mubr.msk.f32.vlgmr.msra.gmra.mrb[6].mxu0 %vm76_vm1, %v535_v24 }
 0x898   :  { %1855 = vmatpush3.bf16.msra.mxu0 %v2202_v5  ;;  %1714 = vmatprep.mubr.msk.f32.mxu1 %vm2102_vm0, %v2103_v1 }
 0x899   :  { %1856 = vmatprep.subr.bf16.mxu0 %v2101_v0  ;;  %1725 = vmatprep.mubr.msk.f32.mxu0 %vm2102_vm0, %v2103_v1 }
 0x89a   :  { %1849 = vmatpush3.bf16.msra.mxu1 %v1848_v45 }
 0x89b   :  { %1850 = vmatprep.subr.bf16.mxu1 %v2101_v0 }
 0x89c   :  { %1858 = vmatpush3.bf16.msra.mxu0 %v2205_v7 }
 0x89d   :  { %1865 = vmatprep.subr.bf16.mxu0 %v2101_v0 }
 0x89e   :  { %1852 = vmatpush3.bf16.msra.mxu1 %v1851_v47 }
 0x89f   :  { %1859 = vmatprep.subr.bf16.mxu1 %v2101_v0 }
 0x96a   :  { %v604_v26 = vpop.f32.mrb[4].mxu1  ;;  %v677_v27 = vpop.f32.mrb[6].mxu0 }
 0x96b   :  { %v608_v28 = vadd.f32 %v604_v26, %v428_v59  ;;  %v681_v29 = vadd.f32 %v677_v27, %v610_v25  ;;  %v1694_v30 = vpop.f32.mrb[5].mxu1  ;;  %v1705_v31 = vpop.f32.mrb[7].mxu0 }
 0x96d   :  { %1937 = vtanh.f32 %v681_v29  ;;  %v1534_v33 = vmul.f32 -1.442695, %v681_v29 }
 0x96f   :  { %1939 = vpow2.f32 %v1534_v33 }
 0x977   :  { %v1938_v32 = vpop.eup %1937 }
 0x978   :  { %696 = vrot.lane.b32.xlu0 %v1938_v32, %s2104_s3 }
 0x979   :  { %v1940_v34 = vpop.eup %1939 }
 0x97a   :  { %v690_v35 = vadd.f32 1.0, %v1940_v34 }
 0x97c   :  { %1941 = vrcp.f32 %v690_v35 }
 0x986   :  { %v1942_v36 = vpop.eup %1941 }
 0x987   :  { %v694_v39 = vmul.f32 %v1942_v36, %v526_v14  ;;  %v1863_v14 = vpack.c.bf16 %v864_v13, %v863_v11  ;;  %v1322_v11 = vld [vmem:[#allocation2 + $0x38] sm:$0xff] }
 0x9ea   :  { %v697_v37 = vpop.permute.xlu0 %696 }
 0x9eb   :  { %v699_v38 = vmul.f32 %v1942_v36, %v697_v37  ;;  %v1040_v37 = vld [vmem:[#allocation7 + $0xa8] sm:$0xff] }
 0x9ed   :  { %701 = vrot.lane.b32.xlu1 %v699_v38, %s2105_s28  ;;  %v1041_v38 = vld [vmem:[#allocation7 + $0xb0] sm:$0xff] }
 0xa5f   :  { %v702_v40 = vpop.permute.xlu1 %701 }
 0xa60   :  { %v704_v41 = vadd.f32 %v702_v40, %v694_v39  ;;  %v1042_v40 = vld [vmem:[#allocation7 + $0xb8] sm:$0xff] }
 0xa62   :  { %1943 = vtanh.f32 %v704_v41 }
 0xa6c   :  { %v1944_v48 = vpop.eup %1943 }
 0xa6d   :  { %707 = vrot.lane.b32.xlu0 %v1944_v48, %s2104_s3 }
 0xadf   :  { %v708_v49 = vpop.permute.xlu0 %707 }
 0xae0   :  { %v710_v50 = vmul.f32 %v1942_v36, %v708_v49  ;;  %v1039_v36 = vld [vmem:[#allocation7 + $0xa0] sm:$0xff] }
 0xae1   :  { %v1872_v39 = vpack.c.bf16 %v1040_v37, %v1039_v36 }
 0xae2   :  { %712 = vrot.lane.b32.xlu1 %v710_v50, %s2105_s28 }
 0xb54   :  { %v713_v51 = vpop.permute.xlu1 %712 }
 0xb55   :  { %1715 = vmatmul.mubr.msk.f32.vlgmr.msra.gmra.mrb[6].mxu1 %vm76_vm1, %v713_v51  ;;  %1726 = vmatmul.mubr.msk.f32.vlgmr.msra.gmra.mrb[8].mxu0 %vm76_vm1, %v713_v51 }
 0xb56   :  { %1867 = vmatpush3.bf16.msra.mxu0 %v2202_v5  ;;  %1736 = vmatprep.mubr.msk.f32.mxu1 %vm2102_vm0, %v2103_v1 }
 0xb57   :  { %1868 = vmatprep.subr.bf16.mxu0 %v2101_v0  ;;  %1747 = vmatprep.mubr.msk.f32.mxu0 %vm2102_vm0, %v2103_v1 }
 0xb58   :  { %1861 = vmatpush3.bf16.msra.mxu1 %v1860_v12 }
 0xb59   :  { %1862 = vmatprep.subr.bf16.mxu1 %v2101_v0 }
 0xb5a   :  { %1870 = vmatpush3.bf16.msra.mxu0 %v2205_v7 }
 0xb5b   :  { %1877 = vmatprep.subr.bf16.mxu0 %v2101_v0 }
 0xb5c   :  { %1864 = vmatpush3.bf16.msra.mxu1 %v1863_v14 }
 0xb5d   :  { %1871 = vmatprep.subr.bf16.mxu1 %v2101_v0 }
 0xc28   :  { %v782_v53 = vpop.f32.mrb[6].mxu1  ;;  %v855_v54 = vpop.f32.mrb[8].mxu0 }
 0xc29   :  { %v786_v55 = vadd.f32 %v782_v53, %v608_v28  ;;  %v859_v56 = vadd.f32 %v855_v54, %v788_v52  ;;  %v1716_v57 = vpop.f32.mrb[7].mxu1  ;;  %v1727_v58 = vpop.f32.mrb[9].mxu0 }
 0xc2b   :  { %1945 = vtanh.f32 %v859_v56  ;;  %v1537_v60 = vmul.f32 -1.442695, %v859_v56 }
 0xc2d   :  { %1947 = vpow2.f32 %v1537_v60 }
 0xc35   :  { %v1946_v59 = vpop.eup %1945 }
 0xc36   :  { %874 = vrot.lane.b32.xlu0 %v1946_v59, %s2104_s3 }
 0xc37   :  { %v1948_v61 = vpop.eup %1947 }
 0xc38   :  { %v868_v62 = vadd.f32 1.0, %v1948_v61  ;;  %v1217_v61 = vld [vmem:[#allocation7 + $0xc0] sm:$0xff] }
 0xc3a   :  { %1949 = vrcp.f32 %v868_v62  ;;  %v1218_v62 = vld [vmem:[#allocation7 + $0xc8] sm:$0xff] }
 0xc44   :  { %v1950_v63 = vpop.eup %1949 }
 0xc45   :  { %v872_v4 = vmul.f32 %v1950_v63, %v704_v41  ;;  %v1875_v41 = vpack.c.bf16 %v1042_v40, %v1041_v38  ;;  %v1548_v38 = vld [vmem:[#allocation8] ss:$0 sm:$0xff] }
 0xca8   :  { %v875_v2 = vpop.permute.xlu0 %874 }
 0xca9   :  { %v877_v3 = vmul.f32 %v1950_v63, %v875_v2  ;;  %v1884_v2 = vpack.c.bf16 %v1218_v62, %v1217_v61 }
 0xcab   :  { %879 = vrot.lane.b32.xlu1 %v877_v3, %s2105_s28  ;;  %v1220_v3 = vld [vmem:[#allocation7 + $0xd8] sm:$0xff] }
 0xd1d   :  { %v880_v6 = vpop.permute.xlu1 %879 }
 0xd1e   :  { %v882_v8 = vadd.f32 %v880_v6, %v872_v4 }
 0xd20   :  { %1951 = vtanh.f32 %v882_v8 }
 0xd2a   :  { %v1952_v15 = vpop.eup %1951 }
 0xd2b   :  { %885 = vrot.lane.b32.xlu0 %v1952_v15, %s2104_s3 }
 0xd9d   :  { %v886_v16 = vpop.permute.xlu0 %885 }
 0xd9e   :  { %v888_v17 = vmul.f32 %v1950_v63, %v886_v16  ;;  %v1219_v63 = vld [vmem:[#allocation7 + $0xd0] sm:$0xff] }
 0xd9f   :  { %v1887_v4 = vpack.c.bf16 %v1220_v3, %v1219_v63 }
 0xda0   :  { %890 = vrot.lane.b32.xlu1 %v888_v17, %s2105_s28 }
 0xe12   :  { %v891_v18 = vpop.permute.xlu1 %890 }
 0xe13   :  { %1737 = vmatmul.mubr.msk.f32.vlgmr.msra.gmra.mrb[8].mxu1 %vm76_vm1, %v891_v18  ;;  %1748 = vmatmul.mubr.msk.f32.vlgmr.msra.gmra.mrb[10].mxu0 %vm76_vm1, %v891_v18 }
 0xe14   :  { %1879 = vmatpush3.bf16.msra.mxu0 %v2202_v5  ;;  %1758 = vmatprep.mubr.msk.f32.mxu1 %vm2102_vm0, %v2103_v1 }
 0xe15   :  { %1880 = vmatprep.subr.bf16.mxu0 %v2101_v0  ;;  %1769 = vmatprep.mubr.msk.f32.mxu0 %vm2102_vm0, %v2103_v1 }
 0xe16   :  { %1873 = vmatpush3.bf16.msra.mxu1 %v1872_v39 }
 0xe17   :  { %1874 = vmatprep.subr.bf16.mxu1 %v2101_v0 }
 0xe18   :  { %1882 = vmatpush3.bf16.msra.mxu0 %v2205_v7 }
 0xe19   :  { %1889 = vmatprep.subr.bf16.mxu0 %v2101_v0 }
 0xe1a   :  { %1876 = vmatpush3.bf16.msra.mxu1 %v1875_v41 }
 0xe1b   :  { %1883 = vmatprep.subr.bf16.mxu1 %v2101_v0 }
 0xee6   :  { %v960_v20 = vpop.f32.mrb[8].mxu1  ;;  %v1033_v21 = vpop.f32.mrb[10].mxu0 }
 0xee7   :  { %v964_v22 = vadd.f32 %v960_v20, %v786_v55  ;;  %v1037_v23 = vadd.f32 %v1033_v21, %v966_v19  ;;  %v1738_v24 = vpop.f32.mrb[9].mxu1  ;;  %v1749_v25 = vpop.f32.mrb[11].mxu0 }
 0xee9   :  { %1953 = vtanh.f32 %v1037_v23  ;;  %v1540_v27 = vmul.f32 -1.442695, %v1037_v23 }
 0xeeb   :  { %1955 = vpow2.f32 %v1540_v27  ;;  %v1395_v27 = vld [vmem:[#allocation7 + $0xe0] sm:$0xff] }
 0xef3   :  { %v1954_v26 = vpop.eup %1953 }
 0xef4   :  { %1052 = vrot.lane.b32.xlu0 %v1954_v26, %s2104_s3 }
 0xef5   :  { %v1956_v28 = vpop.eup %1955 }
 0xef6   :  { %v1046_v29 = vadd.f32 1.0, %v1956_v28  ;;  %v1396_v28 = vld [vmem:[#allocation7 + $0xe8] sm:$0xff] }
 0xef8   :  { %1957 = vrcp.f32 %v1046_v29  ;;  %v1397_v29 = vld [vmem:[#allocation7 + $0xf0] sm:$0xff] }
 0xf02   :  { %v1958_v30 = vpop.eup %1957 }
 0xf03   :  { %v1050_v33 = vmul.f32 %v1958_v30, %v882_v8 }
 0xf66   :  { %v1053_v31 = vpop.permute.xlu0 %1052 }
 0xf67   :  { %v1055_v32 = vmul.f32 %v1958_v30, %v1053_v31  ;;  %v1398_v31 = vld [vmem:[#allocation7 + $0xf8] sm:$0xff] }
 0xf69   :  { %1057 = vrot.lane.b32.xlu1 %v1055_v32, %s2105_s28  ;;  %v1899_v32 = vpack.c.bf16 %v1398_v31, %v1397_v29 }
 0xfdb   :  { %v1058_v34 = vpop.permute.xlu1 %1057 }
 0xfdc   :  { %v1060_v35 = vadd.f32 %v1058_v34, %v1050_v33 }
 0xfde   :  { %1959 = vtanh.f32 %v1060_v35 }
 0xfe8   :  { %v1960_v42 = vpop.eup %1959 }
 0xfe9   :  { %1063 = vrot.lane.b32.xlu0 %v1960_v42, %s2104_s3 }
0x105b   :  { %v1064_v43 = vpop.permute.xlu0 %1063 }
0x105c   :  { %v1066_v44 = vmul.f32 %v1958_v30, %v1064_v43  ;;  %v1896_v30 = vpack.c.bf16 %v1396_v28, %v1395_v27 }
0x105e   :  { %1068 = vrot.lane.b32.xlu1 %v1066_v44, %s2105_s28 }
0x10d0   :  { %v1069_v45 = vpop.permute.xlu1 %1068 }
0x10d1   :  { %1759 = vmatmul.mubr.msk.f32.vlgmr.msra.gmra.mrb[10].mxu1 %vm76_vm1, %v1069_v45  ;;  %1770 = vmatmul.mubr.msk.f32.vlgmr.msra.gmra.mrb[12].mxu0 %vm76_vm1, %v1069_v45 }
0x10d2   :  { %1891 = vmatpush3.bf16.msra.mxu0 %v2202_v5  ;;  %1780 = vmatprep.mubr.msk.f32.mxu1 %vm2102_vm0, %v2103_v1 }
0x10d3   :  { %1892 = vmatprep.subr.bf16.mxu0 %v2101_v0  ;;  %1791 = vmatprep.mubr.msk.f32.mxu0 %vm2102_vm0, %v2103_v1 }
0x10d4   :  { %1885 = vmatpush3.bf16.msra.mxu1 %v1884_v2 }
0x10d5   :  { %1886 = vmatprep.subr.bf16.mxu1 %v2101_v0 }
0x10d6   :  { %1894 = vmatpush3.bf16.msra.mxu0 %v2205_v7 }
0x10d8   :  { %1888 = vmatpush3.bf16.msra.mxu1 %v1887_v4 }
0x10d9   :  { %1895 = vmatprep.subr.bf16.mxu1 %v2101_v0 }
0x11a4   :  { %v1138_v47 = vpop.f32.mrb[10].mxu1  ;;  %v1211_v48 = vpop.f32.mrb[12].mxu0 }
0x11a5   :  { %v1142_v49 = vadd.f32 %v1138_v47, %v964_v22  ;;  %v1215_v50 = vadd.f32 %v1211_v48, %v1144_v46  ;;  %v1760_v51 = vpop.f32.mrb[11].mxu1  ;;  %v1771_v52 = vpop.f32.mrb[13].mxu0 }
0x11a7   :  { %1961 = vtanh.f32 %v1215_v50  ;;  %v1543_v5 = vmul.f32 -1.442695, %v1215_v50 }
0x11a9   :  { %1963 = vpow2.f32 %v1543_v5 }
0x11b1   :  { %v1962_v53 = vpop.eup %1961 }
0x11b2   :  { %1230 = vrot.lane.b32.xlu0 %v1962_v53, %s2104_s3 }
0x11b3   :  { %v1964_v54 = vpop.eup %1963 }
0x11b4   :  { %v1224_v55 = vadd.f32 1.0, %v1964_v54 }
0x11b6   :  { %1965 = vrcp.f32 %v1224_v55 }
0x11c0   :  { %v1966_v56 = vpop.eup %1965 }
0x11c1   :  { %v1228_v7 = vmul.f32 %v1966_v56, %v1060_v35 }
0x1224   :  { %v1231_v57 = vpop.permute.xlu0 %1230 }
0x1225   :  { %v1233_v58 = vmul.f32 %v1966_v56, %v1231_v57 }
0x1227   :  { %1235 = vrot.lane.b32.xlu1 %v1233_v58, %s2105_s28 }
0x1299   :  { %v1236_v59 = vpop.permute.xlu1 %1235 }
0x129a   :  { %v1238_v60 = vadd.f32 %v1236_v59, %v1228_v7 }
0x129c   :  { %1967 = vtanh.f32 %v1238_v60 }
0x12a6   :  { %v1968_v6 = vpop.eup %1967 }
0x12a7   :  { %1241 = vrot.lane.b32.xlu0 %v1968_v6, %s2104_s3 }
0x1319   :  { %v1242_v8 = vpop.permute.xlu0 %1241 }
0x131a   :  { %v1244_v9 = vmul.f32 %v1966_v56, %v1242_v8 }
0x131c   :  { %1246 = vrot.lane.b32.xlu1 %v1244_v9, %s2105_s28 }
0x138e   :  { %v1247_v10 = vpop.permute.xlu1 %1246 }
0x138f   :  { %1781 = vmatmul.mubr.msk.f32.vlgmr.msra.gmra.mrb[12].mxu1 %vm76_vm1, %v1247_v10  ;;  %1792 = vmatmul.mubr.msk.f32.vlgmr.msra.gmra.mrb[14].mxu0 %vm76_vm1, %v1247_v10 }
0x1390   :  { %1802 = vmatprep.mubr.msk.f32.mxu1 %vm2102_vm0, %v2103_v1  ;;  %1897 = vmatpush3.bf16.msra.mxu1 %v1896_v30 }
0x1391   :  { %1898 = vmatprep.subr.bf16.mxu1 %v2101_v0 }
0x1394   :  { %1900 = vmatpush3.bf16.msra.mxu1 %v1899_v32 }
0x1462   :  { %v1316_v12 = vpop.f32.mrb[12].mxu1  ;;  %v1389_v13 = vpop.f32.mrb[14].mxu0 }
0x1463   :  { %v1320_v14 = vadd.f32 %v1316_v12, %v1142_v49  ;;  %v1393_v15 = vadd.f32 %v1389_v13, %v1322_v11  ;;  %v1782_v16 = vpop.f32.mrb[13].mxu1  ;;  %v1793_v17 = vpop.f32.mrb[15].mxu0 }
0x1465   :  { %1969 = vtanh.f32 %v1393_v15  ;;  %v1546_v19 = vmul.f32 -1.442695, %v1393_v15 }
0x1467   :  { %1971 = vpow2.f32 %v1546_v19 }
0x146f   :  { %v1970_v18 = vpop.eup %1969 }
0x1470   :  { %1408 = vrot.lane.b32.xlu0 %v1970_v18, %s2104_s3 }
0x1471   :  { %v1972_v20 = vpop.eup %1971 }
0x1472   :  { %v1402_v21 = vadd.f32 1.0, %v1972_v20 }
0x1474   :  { %1973 = vrcp.f32 %v1402_v21 }
0x147e   :  { %v1974_v22 = vpop.eup %1973 }
0x147f   :  { %v1406_v1 = vmul.f32 %v1974_v22, %v1238_v60 }
0x14e2   :  { %v1409_v23 = vpop.permute.xlu0 %1408 }
0x14e3   :  { %v1411_v24 = vmul.f32 %v1974_v22, %v1409_v23 }
0x14e5   :  { %1413 = vrot.lane.b32.xlu1 %v1411_v24, %s2105_s28 }
0x1557   :  { %v1414_v25 = vpop.permute.xlu1 %1413 }
0x1558   :  { %v1416_v26 = vadd.f32 %v1414_v25, %v1406_v1 }
0x155a   :  { %1975 = vtanh.f32 %v1416_v26 }
0x1564   :  { %v1976_v33 = vpop.eup %1975 }
0x1565   :  { %1419 = vrot.lane.b32.xlu0 %v1976_v33, %s2104_s3 }
0x15d7   :  { %v1420_v34 = vpop.permute.xlu0 %1419 }
0x15d8   :  { %v1422_v35 = vmul.f32 %v1974_v22, %v1420_v34 }
0x15da   :  { %1424 = vrot.lane.b32.xlu1 %v1422_v35, %s2105_s28 }
0x164c   :  { %v1425_v36 = vpop.permute.xlu1 %1424 }
0x164d   :  { %1803 = vmatmul.mubr.msk.f32.vlgmr.msra.gmra.mrb[14].mxu1 %vm76_vm1, %v1425_v36 }
0x1720   :  { %v1494_v37 = vpop.f32.mrb[14].mxu1 }
0x1721   :  { %v1498_v39 = vadd.f32 %v1494_v37, %v1320_v14  ;;  %v1804_v40 = vpop.f32.mrb[15].mxu1 }
0x1723   :  { %v1506_v41 = vadd.f32 %v1548_v38, %v1498_v39 }
0x1725   :  { %1507 = vst [vmem:[#allocation10] sm:$0xff] %v1506_v41 }
0x1726   :  { %2076 = shalt.err (!%p2073_p8)
}
0x1727   :  { %s2077_s16 = scalar_lea.hbm %s2344_s4, 128 }
0x1728   :  { %p2078_p9 = scmp.ne.s32.totalorder %s2344_s4, %s2077_s16  ;;  %p2081_p10 = scmp.lt.u32.totalorder %s2077_s16, %s2344_s4 }
0x172a   :  { %p2083_p11 = pnand %p2081_p10, %p2078_p9 }
0x172c   :  { %2086 = shalt.err (!%p2083_p11)
}
0x172d   :  { %1517 = dma.vmem_to_hbm [thread:$0]  %s1515_s1, 128, %s2344_s4, [#allocation4]  }
0x172e   :  { %2093 = dma.done.wait [#allocation4], 128  }
0x172f   :  { %2094 = vsyncadd [#allocation4], 4294967168 }
0x1730   :  { %1521 = vsyncpa [#allocation3], 1 }
0x1731   :  { %1522 = vsyncpa [#allocation6], 1 }
0x1732   :  { %1523 = vsyncpa [#allocation9], 1 }
0x1733   :  { %1524 = vsyncpa [#allocation4], 1 }

</bundles_post_ra>
